<compile_context>
chip_gen: v5e
topology: v5e:2x2
jax: 0.10.0
libtpu: 0.0.40
codegen_flags: <defaults>
</compile_context>

<pallas_src>
import functools

import jax
import jax.numpy as jnp
from jax.experimental import pallas as pl
from jax.experimental.pallas import tpu as pltpu


def policy_kernel(x_ref, w1_ref, b1_ref, w2_ref, b2_ref, w3_ref, b3_ref,
                  mean_ref):
    # x_ref:    (num_inputs, TB)   -- batch tile on the lane axis
    # w1_ref:   (64, num_inputs)   b1_ref: (64, 1)
    # w2_ref:   (64, 64)           b2_ref: (64, 1)
    # w3_ref:   (num_outputs, 64)  b3_ref: (num_outputs, 1)
    # mean_ref: (num_outputs, TB)
    x = x_ref[...]

    h1 = jnp.tanh(
        jnp.dot(w1_ref[...], x, preferred_element_type=jnp.float32)
        + b1_ref[...]
    )
    h2 = jnp.tanh(
        jnp.dot(w2_ref[...], h1, preferred_element_type=jnp.float32)
        + b2_ref[...]
    )
    mean_ref[...] = (
        jnp.dot(w3_ref[...], h2, preferred_element_type=jnp.float32)
        + b3_ref[...]
    )


@functools.partial(jax.jit, static_argnames=("block_batch",))
def policy_forward(x, params, *, block_batch=1024):
    """Policy forward pass (discrete=False).

    x: (B, num_inputs) float32
    params: dict with w1 (num_inputs,64), b1 (1,64), w2 (64,64), b2 (1,64),
            w3 (64,num_outputs), b3 (1,num_outputs), log_std (1,num_outputs)
            (same layout as PyTorch nn.Linear with W = weight.T).
    Returns (action_mean, action_log_std, action_std), each (B, num_outputs).
    """
    B, num_inputs = x.shape
    hidden = params["w1"].shape[1]            # 64
    num_outputs = params["w3"].shape[1]

    # --- layout plumbing in the wrapper (cheap, one-time XLA ops) ------------
    # Transposed (feature-major) operands so the batch tile sits on the lane axis.
    w1_t = params["w1"].T                      # (64, num_inputs)
    w2_t = params["w2"].T                      # (64, 64)
    w3_t = params["w3"].T                      # (num_outputs, 64)
    b1_c = params["b1"].reshape(hidden, 1)     # (64, 1)
    b2_c = params["b2"].reshape(hidden, 1)     # (64, 1)
    b3_c = params["b3"].reshape(num_outputs, 1)

    # Pick a lane-aligned batch tile (multiple of 128) and pad B up to it.
    tb = min(block_batch, pl.cdiv(B, 128) * 128)
    tb = max(tb, 128)
    b_pad = pl.cdiv(B, tb) * tb

    x_t = x.T                                  # (num_inputs, B)
    if b_pad != B:
        x_t = jnp.pad(x_t, ((0, 0), (0, b_pad - B)))

    grid = (b_pad // tb,)

    full = lambda shape: pl.BlockSpec(shape, lambda i: (0, 0))

    mean_t = pl.pallas_call(
        policy_kernel,
        out_shape=jax.ShapeDtypeStruct((num_outputs, b_pad), jnp.float32),
        grid=grid,
        in_specs=[
            pl.BlockSpec((num_inputs, tb), lambda i: (0, i)),   # x tile (pipelined)
            full((hidden, num_inputs)),                         # w1^T  (resident)
            full((hidden, 1)),                                  # b1
            full((hidden, hidden)),                             # w2^T
            full((hidden, 1)),                                  # b2
            full((num_outputs, hidden)),                        # w3^T
            full((num_outputs, 1)),                             # b3
        ],
        out_specs=pl.BlockSpec((num_outputs, tb), lambda i: (0, i)),
        compiler_params=pltpu.CompilerParams(
            dimension_semantics=("parallel",),
        ),
    )(x_t, w1_t, b1_c, w2_t, b2_c, w3_t, b3_c)

    action_mean = mean_t[:, :B].T              # back to (B, num_outputs)

    # log_std / std are functions of a (1, num_outputs) parameter only:
    # compute once, broadcast lazily (no per-row exp, no extra HBM kernel outputs).
    log_std_row = params["log_std"]                       # (1, num_outputs)
    action_log_std = jnp.broadcast_to(log_std_row, action_mean.shape)
    action_std = jnp.broadcast_to(jnp.exp(log_std_row), action_mean.shape)

    return action_mean, action_log_std, action_std


def init_policy_params(key, num_inputs, num_outputs):
    """Deterministic synthetic init matching the module's parameter shapes."""
    k1, k2, k3, k4, k5 = jax.random.split(key, 5)

    def uniform_linear(kw, kb, fan_in, fan_out):
        # PyTorch-style U(-1/sqrt(fan_in), 1/sqrt(fan_in)); stored as (in, out)
        bound = 1.0 / jnp.sqrt(jnp.float32(fan_in))
        w = jax.random.uniform(kw, (fan_in, fan_out), jnp.float32, -bound, bound)
        b = jax.random.uniform(kb, (1, fan_out), jnp.float32, -bound, bound)
        return w, b

    w1, b1 = uniform_linear(k1, k2, num_inputs, 64)
    w2, b2 = uniform_linear(k3, k4, 64, 64)
    w3, b3 = uniform_linear(k5, jax.random.fold_in(k5, 1), 64, num_outputs)
    # action_mean.weight *= 0.1 ; action_mean.bias *= 0.0
    w3 = w3 * 0.1
    b3 = b3 * 0.0
    # action_log_std = zeros(1, num_outputs)
    log_std = jnp.zeros((1, num_outputs), jnp.float32)

    return {
        "w1": w1, "b1": b1,
        "w2": w2, "b2": b2,
        "w3": w3, "b3": b3,
        "log_std": log_std,
    }


if __name__ == "__main__":
    key = jax.random.PRNGKey(0)
    B, num_inputs, num_outputs = 4, 32, 8

    kx, kp = jax.random.split(key)
    x = jax.random.normal(kx, (B, num_inputs), jnp.float32)
    params = init_policy_params(kp, num_inputs, num_outputs)

    action_mean, action_log_std, action_std = policy_forward(x, params)
    jax.block_until_ready((action_mean, action_log_std, action_std))

    # Reference check in plain JAX (matches the PyTorch forward, discrete=False)
    h1 = jnp.tanh(x @ params["w1"] + params["b1"])
    h2 = jnp.tanh(h1 @ params["w2"] + params["b2"])
    mean_ref = h2 @ params["w3"] + params["b3"]
    logstd_ref = jnp.broadcast_to(params["log_std"], mean_ref.shape)
    std_ref = jnp.exp(logstd_ref)

    assert action_mean.shape == (B, num_outputs)
    assert jnp.allclose(action_mean, mean_ref, atol=1e-5)
    assert jnp.allclose(action_log_std, logstd_ref, atol=1e-6)
    assert jnp.allclose(action_std, std_ref, atol=1e-6)

    # TODO(synk): discrete=True branch (sigmoid + Softmax) and the
    # saved_actions/rewards/final_value bookkeeping are not part of this kernel.

    print("KERNEL_OK")
</pallas_src>

<mosaic_0001>
module attributes {stable_mosaic.version = 11 : i64} {
  func.func @policy_kernel(%arg0: i32, %arg1: memref<32x128xf32, #tpu.memory_space<vmem>>, %arg2: memref<64x32xf32, #tpu.memory_space<vmem>>, %arg3: memref<64x1xf32, #tpu.memory_space<vmem>>, %arg4: memref<64x64xf32, #tpu.memory_space<vmem>>, %arg5: memref<64x1xf32, #tpu.memory_space<vmem>>, %arg6: memref<8x64xf32, #tpu.memory_space<vmem>>, %arg7: memref<8x1xf32, #tpu.memory_space<vmem>>, %arg8: memref<8x128xf32, #tpu.memory_space<vmem>>) attributes {dimension_semantics = [#tpu.dimension_semantics<parallel>], iteration_bounds = array<i64: 1>, scalar_prefetch = 0 : i64, scratch_operands = 0 : i64, tpu.core_type = #tpu.core_type<tc>, window_params = [{transform_indices = @transform_0, window_bounds = array<i64: 32, 128>}, {pipeline_mode = #tpu.pipeline_mode<synchronous>, transform_indices = @transform_1, window_bounds = array<i64: 64, 32>}, {pipeline_mode = #tpu.pipeline_mode<synchronous>, transform_indices = @transform_2, window_bounds = array<i64: 64, 1>}, {pipeline_mode = #tpu.pipeline_mode<synchronous>, transform_indices = @transform_3, window_bounds = array<i64: 64, 64>}, {pipeline_mode = #tpu.pipeline_mode<synchronous>, transform_indices = @transform_4, window_bounds = array<i64: 64, 1>}, {pipeline_mode = #tpu.pipeline_mode<synchronous>, transform_indices = @transform_5, window_bounds = array<i64: 8, 64>}, {pipeline_mode = #tpu.pipeline_mode<synchronous>, transform_indices = @transform_6, window_bounds = array<i64: 8, 1>}, {transform_indices = @transform_7, window_bounds = array<i64: 8, 128>}]} {
    %c0 = arith.constant 0 : index
    %c0_0 = arith.constant 0 : index
    %0 = vector.load %arg1[%c0, %c0_0] : memref<32x128xf32, #tpu.memory_space<vmem>>, vector<32x128xf32>
    %c0_1 = arith.constant 0 : index
    %c0_2 = arith.constant 0 : index
    %1 = vector.load %arg2[%c0_1, %c0_2] : memref<64x32xf32, #tpu.memory_space<vmem>>, vector<64x32xf32>
    %cst = arith.constant dense<0.000000e+00> : vector<64x128xf32>
    %2 = tpu.matmul %1, %0, %cst {dimension_numbers = #tpu.dot_dimension_numbers<[1], [0], [0], [1], [0, 0, 1, 1], [], []>} : vector<64x32xf32>, vector<32x128xf32>, vector<64x128xf32> -> vector<64x128xf32>
    %c0_3 = arith.constant 0 : index
    %c0_4 = arith.constant 0 : index
    %3 = vector.load %arg3[%c0_3, %c0_4] : memref<64x1xf32, #tpu.memory_space<vmem>>, vector<64x1xf32>
    %4 = vector.broadcast %3 : vector<64x1xf32> to vector<64x128xf32>
    %5 = arith.addf %2, %4 : vector<64x128xf32>
    %6 = math.tanh %5 : vector<64x128xf32>
    %c0_5 = arith.constant 0 : index
    %c0_6 = arith.constant 0 : index
    %7 = vector.load %arg4[%c0_5, %c0_6] : memref<64x64xf32, #tpu.memory_space<vmem>>, vector<64x64xf32>
    %cst_7 = arith.constant dense<0.000000e+00> : vector<64x128xf32>
    %8 = tpu.matmul %7, %6, %cst_7 {dimension_numbers = #tpu.dot_dimension_numbers<[1], [0], [0], [1], [0, 0, 1, 1], [], []>} : vector<64x64xf32>, vector<64x128xf32>, vector<64x128xf32> -> vector<64x128xf32>
    %c0_8 = arith.constant 0 : index
    %c0_9 = arith.constant 0 : index
    %9 = vector.load %arg5[%c0_8, %c0_9] : memref<64x1xf32, #tpu.memory_space<vmem>>, vector<64x1xf32>
    %10 = vector.broadcast %9 : vector<64x1xf32> to vector<64x128xf32>
    %11 = arith.addf %8, %10 : vector<64x128xf32>
    %12 = math.tanh %11 : vector<64x128xf32>
    %c0_10 = arith.constant 0 : index
    %c0_11 = arith.constant 0 : index
    %13 = vector.load %arg6[%c0_10, %c0_11] : memref<8x64xf32, #tpu.memory_space<vmem>>, vector<8x64xf32>
    %cst_12 = arith.constant dense<0.000000e+00> : vector<8x128xf32>
    %14 = tpu.matmul %13, %12, %cst_12 {dimension_numbers = #tpu.dot_dimension_numbers<[1], [0], [0], [1], [0, 0, 1, 1], [], []>} : vector<8x64xf32>, vector<64x128xf32>, vector<8x128xf32> -> vector<8x128xf32>
    %c0_13 = arith.constant 0 : index
    %c0_14 = arith.constant 0 : index
    %15 = vector.load %arg7[%c0_13, %c0_14] : memref<8x1xf32, #tpu.memory_space<vmem>>, vector<8x1xf32>
    %16 = vector.broadcast %15 : vector<8x1xf32> to vector<8x128xf32>
    %17 = arith.addf %14, %16 : vector<8x128xf32>
    %c0_15 = arith.constant 0 : index
    %c0_16 = arith.constant 0 : index
    %18 = vector.load %arg8[%c0_15, %c0_16] : memref<8x128xf32, #tpu.memory_space<vmem>>, vector<8x128xf32>
    tpu.vector_store %arg8[%c0_15, %c0_16], %17 {strides = array<i32>} : memref<8x128xf32, #tpu.memory_space<vmem>>, vector<8x128xf32>,
    return
  }
  func.func @transform_0(%arg0: i32) -> (i32, i32) {
    %c0_i32 = arith.constant 0 : i32
    %c0_i32_0 = arith.constant 0 : i32
    return %c0_i32, %arg0 : i32, i32
  }
  func.func @transform_1(%arg0: i32) -> (i32, i32) {
    %c0_i32 = arith.constant 0 : i32
    %c0_i32_0 = arith.constant 0 : i32
    %c0_i32_1 = arith.constant 0 : i32
    return %c0_i32, %c0_i32_0 : i32, i32
  }
  func.func @transform_2(%arg0: i32) -> (i32, i32) {
    %c0_i32 = arith.constant 0 : i32
    %c0_i32_0 = arith.constant 0 : i32
    %c0_i32_1 = arith.constant 0 : i32
    return %c0_i32, %c0_i32_0 : i32, i32
  }
  func.func @transform_3(%arg0: i32) -> (i32, i32) {
    %c0_i32 = arith.constant 0 : i32
    %c0_i32_0 = arith.constant 0 : i32
    %c0_i32_1 = arith.constant 0 : i32
    return %c0_i32, %c0_i32_0 : i32, i32
  }
  func.func @transform_4(%arg0: i32) -> (i32, i32) {
    %c0_i32 = arith.constant 0 : i32
    %c0_i32_0 = arith.constant 0 : i32
    %c0_i32_1 = arith.constant 0 : i32
    return %c0_i32, %c0_i32_0 : i32, i32
  }
  func.func @transform_5(%arg0: i32) -> (i32, i32) {
    %c0_i32 = arith.constant 0 : i32
    %c0_i32_0 = arith.constant 0 : i32
    %c0_i32_1 = arith.constant 0 : i32
    return %c0_i32, %c0_i32_0 : i32, i32
  }
  func.func @transform_6(%arg0: i32) -> (i32, i32) {
    %c0_i32 = arith.constant 0 : i32
    %c0_i32_0 = arith.constant 0 : i32
    %c0_i32_1 = arith.constant 0 : i32
    return %c0_i32, %c0_i32_0 : i32, i32
  }
  func.func @transform_7(%arg0: i32) -> (i32, i32) {
    %c0_i32 = arith.constant 0 : i32
    %c0_i32_0 = arith.constant 0 : i32
    return %c0_i32, %arg0 : i32, i32
  }
}

</mosaic_0001>

<bundles_post_ra>
// kernel: policy_forward.1
= control target key start
LH: loop header
LB: loop body
LE: loop exit
PB: predicated region body
PF: predicated region fallthrough
CT: control target
= control target key end

     0   :  { %v390_v0 = vmov 0   ;;  %vm86_vm0 = vcmask 261120   ;;  %vm216_vm1 = vcmask 523264   ;;  %s565_s2 = inlined_call_operand.vmem [shape: f32[64,1], index: 2, kind: input, shape index: {}]   ;;  %s566_s0 = inlined_call_operand.vmem [shape: f32[32,128], index: 0, kind: input, shape index: {}]   ;;  %s567_s1 = inlined_call_operand.vmem [shape: f32[64,32], index: 1, kind: input, shape index: {}]   ;;  %s568_s4 = inlined_call_operand.vmem [shape: f32[64,1], index: 4, kind: input, shape index: {}]   ;;  %s569_s6 = inlined_call_operand.vmem [shape: f32[8,1], index: 6, kind: input, shape index: {}]   ;;  %s570_s3 = inlined_call_operand.vmem [shape: f32[64,64], index: 3, kind: input, shape index: {}]   ;;  %s571_s5 = inlined_call_operand.vmem [shape: f32[8,64], index: 5, kind: input, shape index: {}]   ;;  %s572_s7 = inlined_call_operand.vmem [shape: f32[8,128], index: 7, kind: output, shape index: {}]  }
   0x1   :  { %355 = vset.pattern.permute.xlu0 %v390_v0  ;;  %v45_v1 = vld [vmem:[%s565_s2 + $0x38] sm:$0xff]  ;;  %356 = vset.pattern.permute.xlu1 %v390_v0  ;;  %v43_v3 = vld [vmem:[%s565_s2 + $0x28] sm:$0xff]  ;;  %v28_v4 = vld [vmem:[%s566_s0 + $0x10] sm:$0xff] }
   0x2   :  { %v29_v2 = vld [vmem:[%s566_s0 + $0x18] sm:$0xff]  ;;  %83 = vperm.xlu0 %355, %v45_v1   ;;  %73 = vperm.xlu1 %356, %v43_v3   ;;  %v27_v5 = vld [vmem:[%s566_s0 + $0x8] sm:$0xff]  ;;  %v26_v6 = vld [vmem:[%s566_s0] sm:$0xff] }
   0x3   :  { %123 = vmatpush.msra.mxu0 %v29_v2  ;;  %342 = vmatpush.msra.mxu2 %v29_v2  ;;  %v30_v7 = vld [vmem:[%s567_s1] sm:$0xff]  ;;  %v35_v8 = vld [vmem:[%s567_s1 + $0x28] sm:$0xff]  ;;  %v44_v9 = vld [vmem:[%s565_s2 + $0x30] sm:$0xff] }
   0x4   :  { %357 = vset.pattern.permute.xlu2 %v390_v0  ;;  %v42_v10 = vld [vmem:[%s565_s2 + $0x20] sm:$0xff]  ;;  %v41_v11 = vld [vmem:[%s565_s2 + $0x18] sm:$0xff]  ;;  %v31_v12 = vld [vmem:[%s567_s1 + $0x8] sm:$0xff] }
   0x5   :  { %124 = vmatpush.msra.mxu0 %v28_v4  ;;  %343 = vmatpush.msra.mxu2 %v28_v4  ;;  %v36_v13 = vld [vmem:[%s567_s1 + $0x30] sm:$0xff]  ;;  %v39_v14 = vld [vmem:[%s565_s2 + $0x8] sm:$0xff]  ;;  %v38_v15 = vld [vmem:[%s565_s2] sm:$0xff] }
   0x6   :  { %63 = vperm.xlu2 %357, %v41_v11   ;;  %v40_v16 = vld [vmem:[%s565_s2 + $0x10] sm:$0xff]  ;;  %v37_v18 = vld [vmem:[%s567_s1 + $0x38] sm:$0xff]  ;;  %v173_v20 = vld [vmem:[%s568_s4 + $0x28] sm:$0xff] }
   0x7   :  { %125 = vmatpush.msra.mxu0 %v27_v5  ;;  %344 = vmatpush.msra.mxu2 %v27_v5  ;;  %v32_v17 = vld [vmem:[%s567_s1 + $0x10] sm:$0xff]  ;;  %v175_v21 = vld [vmem:[%s568_s4 + $0x38] sm:$0xff]  ;;  %v172_v25 = vld [vmem:[%s568_s4 + $0x20] sm:$0xff] }
   0x8   :  { %v174_v19 = vld [vmem:[%s568_s4 + $0x30] sm:$0xff]  ;;  %v33_v22 = vld [vmem:[%s567_s1 + $0x18] sm:$0xff]  ;;  %v34_v26 = vld [vmem:[%s567_s1 + $0x20] sm:$0xff] }
   0x9   :  { %126 = vmatpush.msra.mxu0 %v26_v6  ;;  %345 = vmatpush.msra.mxu2 %v26_v6  ;;  %v171_v23 = vld [vmem:[%s568_s4 + $0x18] sm:$0xff]  ;;  %v170_v24 = vld [vmem:[%s568_s4 + $0x10] sm:$0xff]  ;;  %v168_v27 = vld [vmem:[%s568_s4] sm:$0xff] }
   0xa   :  { %325 = vmatmul.msk.f32.vlgmr.msra.gmra.mxu0 %vm86_vm0, %v30_v7  ;;  %330 = vmatmul.msk.f32.vlgmr.msra.gmra.mxu2 %vm86_vm0, %v35_v8  ;;  %v291_v28 = vld [vmem:[%s569_s6] sm:$0xff]  ;;  %v169_v29 = vld [vmem:[%s568_s4 + $0x8] sm:$0xff]  ;;  %v162_v2 = vld [vmem:[%s570_s3 + $0x10] sm:$0xff] }
   0xb   :  { %78 = vperm.xlu0 %355, %v44_v9   ;;  %68 = vperm.xlu1 %356, %v42_v10   ;;  %v160_v61 = vld [vmem:[%s570_s3] sm:$0xff]  ;;  %v161_v0 = vld [vmem:[%s570_s3 + $0x8] sm:$0xff]  ;;  %v166_v3 = vld [vmem:[%s570_s3 + $0x30] sm:$0xff] }
   0xc   :  { %v164_v62 = vld [vmem:[%s570_s3 + $0x20] sm:$0xff]  ;;  %v165_v1 = vld [vmem:[%s570_s3 + $0x28] sm:$0xff]  ;;  %v163_v4 = vld [vmem:[%s570_s3 + $0x18] sm:$0xff] }
   0xd   :  { %v167_v5 = vld [vmem:[%s570_s3 + $0x38] sm:$0xff] }
   0xe   :  { %58 = vperm.xlu2 %357, %v40_v16  }
  0x12   :  { %326 = vmatmul.msk.f32.gmra.mxu0 %vm86_vm0, %v31_v12  ;;  %331 = vmatmul.msk.f32.gmra.mxu2 %vm86_vm0, %v36_v13 }
  0x13   :  { %53 = vperm.xlu0 %355, %v39_v14   ;;  %48 = vperm.xlu1 %356, %v38_v15  }
  0x16   :  { %213 = vperm.xlu2 %357, %v175_v21  }
  0x1a   :  { %327 = vmatmul.msk.f32.gmra.mxu0 %vm86_vm0, %v32_v17  ;;  %332 = vmatmul.msk.f32.gmra.mxu2 %vm86_vm0, %v37_v18 }
  0x1b   :  { %208 = vperm.xlu0 %355, %v174_v19   ;;  %203 = vperm.xlu1 %356, %v173_v20  }
  0x1e   :  { %198 = vperm.xlu2 %357, %v172_v25  }
  0x22   :  { %328 = vmatmul.msk.f32.gmra.mxu0 %vm86_vm0, %v33_v22 }
  0x23   :  { %193 = vperm.xlu0 %355, %v171_v23   ;;  %188 = vperm.xlu1 %356, %v170_v24  }
  0x26   :  { %183 = vperm.xlu2 %357, %v169_v29  }
  0x2a   :  { %329 = vmatmul.msk.f32.gmra.mxu0 %vm86_vm0, %v34_v26 }
  0x2b   :  { %178 = vperm.xlu0 %355, %v168_v27   ;;  %294 = vperm.xlu1 %356, %v291_v28  }
  0x60   :  { %v64_v39 = vpop.permute.xlu2 %63 }
  0x68   :  { %v59_v50 = vpop.permute.xlu2 %58 }
  0x70   :  { %v214_v10 = vpop.permute.xlu2 %213 }
  0x74   :  { %v84_v33 = vpop.permute.xlu0 %83  ;;  %v74_v35 = vpop.permute.xlu1 %73 }
  0x78   :  { %v199_v15 = vpop.permute.xlu2 %198 }
  0x7d   :  { %v79_v37 = vpop.permute.xlu0 %78  ;;  %v69_v43 = vpop.permute.xlu1 %68 }
  0x80   :  { %v184_v27 = vpop.permute.xlu2 %183 }
  0x85   :  { %v54_v53 = vpop.permute.xlu0 %53  ;;  %v49_v54 = vpop.permute.xlu1 %48 }
  0x87   :  { %v128_v30 = vpop.f32.mrf.mxu0 }
  0x88   :  { %v129_v56 = vadd.f32 %v128_v30, %v49_v54 }
  0x8d   :  { %v143_v31 = vpop.f32.mrf.mxu2  ;;  %v209_v11 = vpop.permute.xlu0 %208 }
  0x8e   :  { %v144_v44 = vadd.f32 %v143_v31, %v74_v35  ;;  %v204_v14 = vpop.permute.xlu1 %203 }
  0x8f   :  { %v131_v32 = vpop.f32.mrf.mxu0 }
  0x90   :  { %v132_v55 = vadd.f32 %v131_v32, %v54_v53 }
  0x95   :  { %v146_v34 = vpop.f32.mrf.mxu2  ;;  %v194_v19 = vpop.permute.xlu0 %193 }
  0x96   :  { %v147_v40 = vadd.f32 %v146_v34, %v79_v37  ;;  %v189_v24 = vpop.permute.xlu1 %188  ;;  %v290_v37 = vld [vmem:[%s571_s5] sm:$0xff] }
  0x97   :  { %v134_v36 = vpop.f32.mrf.mxu0 }
  0x98   :  { %v135_v51 = vadd.f32 %v134_v36, %v59_v50 }
  0x9d   :  { %v149_v38 = vpop.f32.mrf.mxu2  ;;  %v179_v30 = vpop.permute.xlu0 %178 }
  0x9e   :  { %v150_v41 = vadd.f32 %v149_v38, %v84_v33 }
  0x9f   :  { %v137_v42 = vpop.f32.mrf.mxu0 }
  0xa0   :  { %358 = vtanh.f32 %v150_v41  ;;  %v138_v47 = vadd.f32 %v137_v42, %v64_v39  ;;  %v295_v39 = vpop.permute.xlu1 %294 }
  0xa1   :  { %360 = vtanh.f32 %v147_v40 }
  0xa2   :  { %362 = vtanh.f32 %v144_v44 }
  0xa6   :  { %v359_v45 = vpop.eup %358 }
  0xa7   :  { %v140_v46 = vpop.f32.mrf.mxu0  ;;  %249 = vmatpush.msra.mxu1 %v359_v45  ;;  %346 = vmatpush.msra.mxu3 %v359_v45  ;;  %v361_v49 = vpop.eup %360 }
  0xa8   :  { %v141_v48 = vadd.f32 %v140_v46, %v69_v43  ;;  %v363_v52 = vpop.eup %362 }
  0xa9   :  { %250 = vmatpush.msra.mxu1 %v361_v49  ;;  %347 = vmatpush.msra.mxu3 %v361_v49 }
  0xaa   :  { %364 = vtanh.f32 %v141_v48 }
  0xab   :  { %366 = vtanh.f32 %v138_v47  ;;  %251 = vmatpush.msra.mxu1 %v363_v52  ;;  %348 = vmatpush.msra.mxu3 %v363_v52 }
  0xac   :  { %368 = vtanh.f32 %v135_v51 }
  0xad   :  { %370 = vtanh.f32 %v132_v55 }
  0xae   :  { %372 = vtanh.f32 %v129_v56 }
  0xb0   :  { %v365_v57 = vpop.eup %364 }
  0xb1   :  { %252 = vmatpush.msra.mxu1 %v365_v57  ;;  %349 = vmatpush.msra.mxu3 %v365_v57  ;;  %v367_v58 = vpop.eup %366 }
  0xb2   :  { %v369_v59 = vpop.eup %368 }
  0xb3   :  { %253 = vmatpush.msra.mxu1 %v367_v58  ;;  %350 = vmatpush.msra.mxu3 %v367_v58  ;;  %v371_v60 = vpop.eup %370 }
  0xb4   :  { %v373_v63 = vpop.eup %372 }
  0xb5   :  { %254 = vmatpush.msra.mxu1 %v369_v59  ;;  %351 = vmatpush.msra.mxu3 %v369_v59 }
  0xb7   :  { %255 = vmatpush.msra.mxu1 %v371_v60  ;;  %352 = vmatpush.msra.mxu3 %v371_v60 }
  0xb9   :  { %256 = vmatpush.msra.mxu1 %v373_v63  ;;  %353 = vmatpush.msra.mxu3 %v373_v63 }
  0xba   :  { %333 = vmatmul.msk.f32.vlgmr.msra.gmra.mxu1 %vm216_vm1, %v160_v61  ;;  %337 = vmatmul.msk.f32.vlgmr.msra.gmra.mxu3 %vm216_vm1, %v164_v62 }
  0xc2   :  { %334 = vmatmul.msk.f32.gmra.mxu1 %vm216_vm1, %v161_v0  ;;  %338 = vmatmul.msk.f32.gmra.mxu3 %vm216_vm1, %v165_v1 }
  0xca   :  { %335 = vmatmul.msk.f32.gmra.mxu1 %vm216_vm1, %v162_v2  ;;  %339 = vmatmul.msk.f32.gmra.mxu3 %vm216_vm1, %v166_v3 }
  0xd2   :  { %336 = vmatmul.msk.f32.gmra.mxu1 %vm216_vm1, %v163_v4  ;;  %340 = vmatmul.msk.f32.gmra.mxu3 %vm216_vm1, %v167_v5 }
 0x137   :  { %v258_v6 = vpop.f32.mrf.mxu1 }
 0x138   :  { %v259_v32 = vadd.f32 %v258_v6, %v179_v30 }
 0x13d   :  { %v270_v7 = vpop.f32.mrf.mxu3 }
 0x13e   :  { %v271_v22 = vadd.f32 %v270_v7, %v199_v15 }
 0x13f   :  { %v261_v8 = vpop.f32.mrf.mxu1 }
 0x140   :  { %v262_v29 = vadd.f32 %v261_v8, %v184_v27 }
 0x145   :  { %v273_v9 = vpop.f32.mrf.mxu3 }
 0x146   :  { %v274_v20 = vadd.f32 %v273_v9, %v204_v14 }
 0x147   :  { %v264_v13 = vpop.f32.mrf.mxu1 }
 0x148   :  { %v265_v26 = vadd.f32 %v264_v13, %v189_v24 }
 0x14d   :  { %v276_v12 = vpop.f32.mrf.mxu3 }
 0x14e   :  { %v277_v17 = vadd.f32 %v276_v12, %v209_v11 }
 0x14f   :  { %v267_v21 = vpop.f32.mrf.mxu1 }
 0x150   :  { %v268_v23 = vadd.f32 %v267_v21, %v194_v19 }
 0x155   :  { %v279_v16 = vpop.f32.mrf.mxu3 }
 0x156   :  { %v280_v18 = vadd.f32 %v279_v16, %v214_v10 }
 0x158   :  { %374 = vtanh.f32 %v280_v18 }
 0x159   :  { %376 = vtanh.f32 %v277_v17 }
 0x15a   :  { %378 = vtanh.f32 %v274_v20 }
 0x15b   :  { %380 = vtanh.f32 %v271_v22 }
 0x15c   :  { %382 = vtanh.f32 %v268_v23 }
 0x15d   :  { %384 = vtanh.f32 %v265_v26 }
 0x15e   :  { %v375_v25 = vpop.eup %374  ;;  %386 = vtanh.f32 %v262_v29 }
 0x15f   :  { %308 = vmatpush.msrb.mxu2 %v375_v25  ;;  %v377_v28 = vpop.eup %376  ;;  %388 = vtanh.f32 %v259_v32 }
 0x160   :  { %v379_v31 = vpop.eup %378 }
 0x161   :  { %309 = vmatpush.msrb.mxu2 %v377_v28  ;;  %v381_v33 = vpop.eup %380 }
 0x162   :  { %v383_v34 = vpop.eup %382 }
 0x163   :  { %310 = vmatpush.msrb.mxu2 %v379_v31  ;;  %v385_v35 = vpop.eup %384 }
 0x164   :  { %v387_v36 = vpop.eup %386 }
 0x165   :  { %311 = vmatpush.msrb.mxu2 %v381_v33  ;;  %v389_v38 = vpop.eup %388 }
 0x167   :  { %312 = vmatpush.msrb.mxu2 %v383_v34 }
 0x169   :  { %313 = vmatpush.msrb.mxu2 %v385_v35 }
 0x16b   :  { %314 = vmatpush.msrb.mxu2 %v387_v36 }
 0x16d   :  { %315 = vmatpush.msrb.mxu2 %v389_v38 }
 0x16e   :  { %341 = vmatmul.msk.f32.vlgmr.msrb.gmra.mxu2 %vm216_vm1, %v290_v37 }
 0x1f1   :  { %v317_v40 = vpop.f32.mrf.mxu2 }
 0x1f2   :  { %v318_v41 = vadd.f32 %v317_v40, %v295_v39 }
 0x1f4   :  { %320 = vst [vmem:[%s572_s7] sm:$0xff] %v318_v41 }

</bundles_post_ra>
